<compile_context>
chip_gen: v7x
topology: tpu7x:2x2x1
jax: 0.10.0
libtpu: 0.0.40
codegen_flags: <defaults>
</compile_context>

<pallas_src>
import functools

import jax
import jax.numpy as jnp
from jax.experimental import pallas as pl
from jax.experimental.pallas import tpu as pltpu


# ----------------------------- configuration --------------------------------
CONFIG = {
    "num_users": 32,
    "num_items": 64,
    "latent_dim_mf": 8,
    "latent_dim_mlp": 8,
    # layers[0] must equal 2 * latent_dim_mlp (concat of user+item MLP embeds)
    "layers": [16, 32, 16, 8],
}
BATCH = 8
SLAB_WIDTH = 128  # lane width of the packed parameter slab


# --------------------------- slab layout / packing ---------------------------
def build_layout(config):
    """Static (row_start, n_rows, n_cols) layout of every parameter piece inside
    one (total_rows, SLAB_WIDTH) f32 slab.  Every row_start is 8-aligned."""
    layers = config["layers"]
    d_mlp = config["latent_dim_mlp"]
    d_mf = config["latent_dim_mf"]
    nu, ni = config["num_users"], config["num_items"]
    nfc = len(layers) - 1
    assert layers[0] == 2 * d_mlp, "layers[0] must be 2 * latent_dim_mlp"

    layout = {}
    row = 0

    def add(name, nrows, ncols):
        nonlocal row
        assert ncols <= SLAB_WIDTH
        row = ((row + 7) // 8) * 8          # 8-align every piece's row start
        layout[name] = (row, nrows, ncols)
        row += nrows

    # one combined embedding block: user rows [0:nu), item rows [nu:nu+ni)
    # lanes: [u_mlp | i_mlp | u_mf | i_mf]
    emb_width = 2 * d_mlp + 2 * d_mf
    add("emb_all", nu + ni, emb_width)

    # FC weights (W0 is NOT split: gather output already has [u_mlp|i_mlp] lanes)
    for l in range(nfc):
        add(f"W_{l}", layers[l], layers[l + 1])

    # coalesced 1-row pieces: rows 0..nfc-1 = biases, nfc = wa_mlp,
    # nfc+1 = wa_mf, nfc+2 = ba; padded to a multiple of 8 rows.
    small_rows = ((nfc + 3 + 7) // 8) * 8
    add("small", small_rows, SLAB_WIDTH)

    total_rows = ((row + 7) // 8) * 8
    return layout, total_rows


def pack_slab(params, layout, total_rows, config):
    """Pack all parameters into one padded f32 slab (done once, host side)."""
    d_mlp = config["latent_dim_mlp"]
    d_mf = config["latent_dim_mf"]
    nu = config["num_users"]
    layers = config["layers"]
    nfc = len(layers) - 1
    slab = jnp.zeros((total_rows, SLAB_WIDTH), jnp.float32)

    # --- combined embedding block ---
    r0, nr, _ = layout["emb_all"]
    slab = slab.at[r0:r0 + nu, 0:d_mlp].set(params["emb_user_mlp"].astype(jnp.float32))
    slab = slab.at[r0 + nu:r0 + nr, d_mlp:2 * d_mlp].set(params["emb_item_mlp"].astype(jnp.float32))
    slab = slab.at[r0:r0 + nu, 2 * d_mlp:2 * d_mlp + d_mf].set(params["emb_user_mf"].astype(jnp.float32))
    slab = slab.at[r0 + nu:r0 + nr, 2 * d_mlp + d_mf:2 * d_mlp + 2 * d_mf].set(
        params["emb_item_mf"].astype(jnp.float32))

    # --- FC weights ---
    for l, (w, _) in enumerate(params["fc"]):
        r0, nrw, ncw = layout[f"W_{l}"]
        assert w.shape == (nrw, ncw)
        slab = slab.at[r0:r0 + nrw, 0:ncw].set(w.astype(jnp.float32))

    # --- coalesced small block (biases + affine head) ---
    sr0, _, _ = layout["small"]
    for l, (_, b) in enumerate(params["fc"]):
        slab = slab.at[sr0 + l:sr0 + l + 1, 0:layers[l + 1]].set(b.astype(jnp.float32))
    slab = slab.at[sr0 + nfc:sr0 + nfc + 1, 0:layers[-1]].set(params["affine_w_mlp"].T.astype(jnp.float32))
    slab = slab.at[sr0 + nfc + 1:sr0 + nfc + 2, 0:d_mf].set(params["affine_w_mf"].T.astype(jnp.float32))
    slab = slab.at[sr0 + nfc + 2:sr0 + nfc + 3, 0:1].set(params["affine_b"].astype(jnp.float32))
    return slab


# ------------------------------ Pallas kernel --------------------------------
def neumf_kernel(layout, layers, d_mlp, d_mf, num_users, num_items,
                 idx_ref, slab_ref, out_ref):
    """Fully fused NeuMF forward.

    idx_ref:  (B, 2) int32 in VMEM   — column 0 = user index, column 1 = item.
    slab_ref: (R, 128) f32 in VMEM   — packed parameters (see build_layout).
    out_ref:  (B, 1)  f32 in VMEM    — predicted rating.
    """
    nfc = len(layers) - 1

    def piece(name):
        r0, nr, nc = layout[name]
        return slab_ref[r0:r0 + nr, 0:nc]   # static, 8-row-aligned slice

    idx = idx_ref[...]                       # (B, 2) int32
    batch = idx.shape[0]
    u_idx = idx[:, 0:1]                      # (B, 1), in [0, num_users)
    i_idx = idx[:, 1:2]                      # (B, 1), in [0, num_items)

    # --- single fused embedding gather: one (B, nu+ni) one-hot, one MXU dot ---
    vocab = num_users + num_items
    cols = jax.lax.broadcasted_iota(jnp.int32, (batch, vocab), 1)     # (B, vocab)
    onehot = jnp.logical_or(cols == u_idx,
                            cols == (i_idx + num_users)).astype(jnp.float32)
    emb = jnp.dot(onehot, piece("emb_all"),
                  preferred_element_type=jnp.float32)   # (B, 2*d_mlp + 2*d_mf)

    x_mlp_in = emb[:, 0:2 * d_mlp]                              # (B, 16) = [u_mlp|i_mlp]
    u_mf = emb[:, 2 * d_mlp:2 * d_mlp + d_mf]                   # (B, d_mf)
    i_mf = emb[:, 2 * d_mlp + d_mf:2 * d_mlp + 2 * d_mf]        # (B, d_mf)

    # --- coalesced biases / affine head: one aligned (8,128) load, sliced in-reg ---
    sr0, snr, _ = layout["small"]
    small = slab_ref[sr0:sr0 + snr, :]                          # (snr, 128)

    # --- MLP tower: layer 0 is a single dot against the un-split W0 ---
    x = (jnp.dot(x_mlp_in, piece("W_0"), preferred_element_type=jnp.float32)
         + small[0:1, 0:layers[1]])
    x = jnp.maximum(x, 0.0)
    for l in range(1, nfc):
        x = (jnp.dot(x, piece(f"W_{l}"), preferred_element_type=jnp.float32)
             + small[l:l + 1, 0:layers[l + 1]])
        x = jnp.maximum(x, 0.0)

    # --- GMF branch: pure lane-slice multiply of the gather output ---
    mf = u_mf * i_mf                                            # (B, d_mf)

    # --- affine head: VPU mul + cross-lane reduce (no N=1 MXU matmuls) ---
    wa_mlp = small[nfc:nfc + 1, 0:layers[-1]]                   # (1, layers[-1])
    wa_mf = small[nfc + 1:nfc + 2, 0:d_mf]                      # (1, d_mf)
    ba = small[nfc + 2:nfc + 3, 0:1]                            # (1, 1)
    logits = (jnp.sum(x * wa_mlp, axis=-1, keepdims=True)
              + jnp.sum(mf * wa_mf, axis=-1, keepdims=True)
              + ba)                                             # (B, 1)
    # TODO(synk): at serving batch sizes emit a lane-dense (B//128, 128) score
    #             slab instead of a width-1 last dim (masked vst.msk stores).
    out_ref[...] = jax.nn.sigmoid(logits)


# ------------------------------ wrapper / glue --------------------------------
def make_neumf_forward(config, layout, total_rows):
    layers = tuple(config["layers"])
    d_mlp = config["latent_dim_mlp"]
    d_mf = config["latent_dim_mf"]
    nu, ni = config["num_users"], config["num_items"]
    kernel = functools.partial(neumf_kernel, layout, layers, d_mlp, d_mf, nu, ni)

    @jax.jit
    def forward(user_indices, item_indices, slab):
        batch = user_indices.shape[0]
        # Clamp indices so OOB inputs behave like a clipping gather rather than
        # silently producing zero embeddings (and cannot cross the user/item
        # halves of the fused one-hot).
        u = jnp.clip(user_indices.astype(jnp.int32), 0, nu - 1)
        i = jnp.clip(item_indices.astype(jnp.int32), 0, ni - 1)
        idx = jnp.stack([u, i], axis=-1)                        # (B, 2) int32

        nfc = len(layers) - 1
        flops = 2 * batch * ((nu + ni) * (2 * d_mlp + 2 * d_mf)          # gather dot
                             + sum(layers[l] * layers[l + 1] for l in range(nfc))
                             + layers[-1] + d_mf)                         # affine head
        bytes_accessed = (total_rows * SLAB_WIDTH * 4) + (batch * 2 * 4) + (batch * 4)

        # Single grid point: two operands (indices + packed slab), everything
        # resident in VMEM (~86 KiB of params), one dispatch total.
        # TODO(synk): grid over batch with a (TB, .) block, slab index_map ->
        #             (0, 0) and dimension_semantics=("parallel",) for v7x.
        return pl.pallas_call(
            kernel,
            out_shape=jax.ShapeDtypeStruct((batch, 1), jnp.float32),
            in_specs=[pl.BlockSpec(memory_space=pltpu.VMEM),
                      pl.BlockSpec(memory_space=pltpu.VMEM)],
            out_specs=pl.BlockSpec(memory_space=pltpu.VMEM),
            cost_estimate=pl.CostEstimate(flops=flops,
                                          transcendentals=batch,
                                          bytes_accessed=bytes_accessed),
        )(idx, slab)

    return forward


def init_params(config, key):
    """Deterministic parameter init (shapes mirror the torch module)."""
    k = jax.random.split(key, 16)
    d_mlp = config["latent_dim_mlp"]
    d_mf = config["latent_dim_mf"]
    layers = config["layers"]

    params = {
        "emb_user_mlp": jax.random.normal(k[0], (config["num_users"], d_mlp), jnp.float32) * 0.1,
        "emb_item_mlp": jax.random.normal(k[1], (config["num_items"], d_mlp), jnp.float32) * 0.1,
        "emb_user_mf": jax.random.normal(k[2], (config["num_users"], d_mf), jnp.float32) * 0.1,
        "emb_item_mf": jax.random.normal(k[3], (config["num_items"], d_mf), jnp.float32) * 0.1,
        "fc": [],
    }
    ki = 4
    for in_size, out_size in zip(layers[:-1], layers[1:]):
        w = jax.random.normal(k[ki], (in_size, out_size), jnp.float32) * (1.0 / jnp.sqrt(in_size))
        b = jax.random.normal(k[ki + 1], (1, out_size), jnp.float32) * 0.01
        params["fc"].append((w, b))
        ki += 2
    aff_in = layers[-1] + d_mf
    wa = jax.random.normal(k[ki], (aff_in, 1), jnp.float32) * (1.0 / jnp.sqrt(aff_in))
    ba = jax.random.normal(k[ki + 1], (1, 1), jnp.float32) * 0.01
    # Split affine weight: first layers[-1] rows act on mlp_vector, rest on mf_vector.
    params["affine_w_mlp"] = wa[: layers[-1], :]
    params["affine_w_mf"] = wa[layers[-1]:, :]
    params["affine_b"] = ba
    return params


def neumf_reference(user_indices, item_indices, params):
    """Pure-JAX reference for correctness checking (canonical NeuMF forward)."""
    u_mlp = jnp.take(params["emb_user_mlp"], user_indices, axis=0)
    i_mlp = jnp.take(params["emb_item_mlp"], item_indices, axis=0)
    u_mf = jnp.take(params["emb_user_mf"], user_indices, axis=0)
    i_mf = jnp.take(params["emb_item_mf"], item_indices, axis=0)
    x = jnp.concatenate([u_mlp, i_mlp], axis=-1)
    for w, b in params["fc"]:
        x = jnp.maximum(x @ w + b, 0.0)
    mf = u_mf * i_mf
    vector = jnp.concatenate([x, mf], axis=-1)
    wa = jnp.concatenate([params["affine_w_mlp"], params["affine_w_mf"]], axis=0)
    logits = vector @ wa + params["affine_b"]
    return jax.nn.sigmoid(logits)


if __name__ == "__main__":
    key = jax.random.PRNGKey(0)
    kp, ku, ki = jax.random.split(key, 3)

    params = init_params(CONFIG, kp)
    layout, total_rows = build_layout(CONFIG)
    slab = pack_slab(params, layout, total_rows, CONFIG)      # packed once
    forward = make_neumf_forward(CONFIG, layout, total_rows)

    user_indices = jax.random.randint(ku, (BATCH,), 0, CONFIG["num_users"], dtype=jnp.int32)
    item_indices = jax.random.randint(ki, (BATCH,), 0, CONFIG["num_items"], dtype=jnp.int32)

    out = forward(user_indices, item_indices, slab)
    out = jax.block_until_ready(out)

    ref = neumf_reference(user_indices, item_indices, params)
    assert out.shape == (BATCH, 1)
    assert jnp.allclose(out, ref, atol=1e-5, rtol=1e-5), (out, ref)

    print("KERNEL_OK")
</pallas_src>

<mosaic_0001>
module attributes {stable_mosaic.version = 11 : i64} {
  func.func @neumf_kernel(%arg0: memref<8x2xi32, #tpu.memory_space<vmem>>, %arg1: memref<168x128xf32, #tpu.memory_space<vmem>>, %arg2: memref<8x1xf32, #tpu.memory_space<vmem>>) attributes {dimension_semantics = [], scalar_prefetch = 0 : i64, scratch_operands = 0 : i64, tpu.core_type = #tpu.core_type<tc>} {
    %c0 = arith.constant 0 : index
    %c0_0 = arith.constant 0 : index
    %0 = vector.load %arg0[%c0, %c0_0] : memref<8x2xi32, #tpu.memory_space<vmem>>, vector<8x2xi32>
    %1 = vector.extract_strided_slice %0 {offsets = [0, 0], sizes = [8, 1], strides = [1, 1]} : vector<8x2xi32> to vector<8x1xi32>
    %2 = vector.extract_strided_slice %0 {offsets = [0, 1], sizes = [8, 1], strides = [1, 1]} : vector<8x2xi32> to vector<8x1xi32>
    %3 = tpu.iota {dimensions = array<i32: 1>} : vector<8x96xi32>
    %4 = vector.broadcast %1 : vector<8x1xi32> to vector<8x96xi32>
    %5 = arith.cmpi eq, %3, %4 : vector<8x96xi32>
    %c32_i32 = arith.constant 32 : i32
    %6 = vector.broadcast %c32_i32 : i32 to vector<8x1xi32>
    %7 = arith.addi %2, %6 : vector<8x1xi32>
    %8 = vector.broadcast %7 : vector<8x1xi32> to vector<8x96xi32>
    %9 = arith.cmpi eq, %3, %8 : vector<8x96xi32>
    %10 = arith.ori %5, %9 : vector<8x96xi1>
    %11 = arith.extui %10 : vector<8x96xi1> to vector<8x96xi32>
    %12 = arith.sitofp %11 : vector<8x96xi32> to vector<8x96xf32>
    %c0_1 = arith.constant 0 : index
    %c0_2 = arith.constant 0 : index
    %13 = vector.load %arg1[%c0_1, %c0_2] : memref<168x128xf32, #tpu.memory_space<vmem>>, vector<96x32xf32>
    %cst = arith.constant dense<0.000000e+00> : vector<8x32xf32>
    %14 = tpu.matmul %12, %13, %cst {dimension_numbers = #tpu.dot_dimension_numbers<[1], [0], [0], [1], [0, 0, 1, 1], [], []>} : vector<8x96xf32>, vector<96x32xf32>, vector<8x32xf32> -> vector<8x32xf32>
    %15 = vector.extract_strided_slice %14 {offsets = [0, 0], sizes = [8, 16], strides = [1, 1]} : vector<8x32xf32> to vector<8x16xf32>
    %16 = vector.extract_strided_slice %14 {offsets = [0, 16], sizes = [8, 8], strides = [1, 1]} : vector<8x32xf32> to vector<8x8xf32>
    %17 = vector.extract_strided_slice %14 {offsets = [0, 24], sizes = [8, 8], strides = [1, 1]} : vector<8x32xf32> to vector<8x8xf32>
    %c160 = arith.constant 160 : index
    %c0_3 = arith.constant 0 : index
    %18 = vector.load %arg1[%c160, %c0_3] : memref<168x128xf32, #tpu.memory_space<vmem>>, vector<8x128xf32>
    %c96 = arith.constant 96 : index
    %c0_4 = arith.constant 0 : index
    %19 = vector.load %arg1[%c96, %c0_4] : memref<168x128xf32, #tpu.memory_space<vmem>>, vector<16x32xf32>
    %cst_5 = arith.constant dense<0.000000e+00> : vector<8x32xf32>
    %20 = tpu.matmul %15, %19, %cst_5 {dimension_numbers = #tpu.dot_dimension_numbers<[1], [0], [0], [1], [0, 0, 1, 1], [], []>} : vector<8x16xf32>, vector<16x32xf32>, vector<8x32xf32> -> vector<8x32xf32>
    %21 = vector.extract_strided_slice %18 {offsets = [0, 0], sizes = [1, 32], strides = [1, 1]} : vector<8x128xf32> to vector<1x32xf32>
    %22 = vector.broadcast %21 : vector<1x32xf32> to vector<8x32xf32>
    %23 = arith.addf %20, %22 : vector<8x32xf32>
    %cst_6 = arith.constant 0.000000e+00 : f32
    %24 = vector.broadcast %cst_6 : f32 to vector<8x32xf32>
    %25 = arith.maximumf %23, %24 : vector<8x32xf32>
    %c112 = arith.constant 112 : index
    %c0_7 = arith.constant 0 : index
    %26 = vector.load %arg1[%c112, %c0_7] : memref<168x128xf32, #tpu.memory_space<vmem>>, vector<32x16xf32>
    %cst_8 = arith.constant dense<0.000000e+00> : vector<8x16xf32>
    %27 = tpu.matmul %25, %26, %cst_8 {dimension_numbers = #tpu.dot_dimension_numbers<[1], [0], [0], [1], [0, 0, 1, 1], [], []>} : vector<8x32xf32>, vector<32x16xf32>, vector<8x16xf32> -> vector<8x16xf32>
    %28 = vector.extract_strided_slice %18 {offsets = [1, 0], sizes = [1, 16], strides = [1, 1]} : vector<8x128xf32> to vector<1x16xf32>
    %29 = vector.broadcast %28 : vector<1x16xf32> to vector<8x16xf32>
    %30 = arith.addf %27, %29 : vector<8x16xf32>
    %cst_9 = arith.constant 0.000000e+00 : f32
    %31 = vector.broadcast %cst_9 : f32 to vector<8x16xf32>
    %32 = arith.maximumf %30, %31 : vector<8x16xf32>
    %c144 = arith.constant 144 : index
    %c0_10 = arith.constant 0 : index
    %33 = vector.load %arg1[%c144, %c0_10] : memref<168x128xf32, #tpu.memory_space<vmem>>, vector<16x8xf32>
    %cst_11 = arith.constant dense<0.000000e+00> : vector<8x8xf32>
    %34 = tpu.matmul %32, %33, %cst_11 {dimension_numbers = #tpu.dot_dimension_numbers<[1], [0], [0], [1], [0, 0, 1, 1], [], []>} : vector<8x16xf32>, vector<16x8xf32>, vector<8x8xf32> -> vector<8x8xf32>
    %35 = vector.extract_strided_slice %18 {offsets = [2, 0], sizes = [1, 8], strides = [1, 1]} : vector<8x128xf32> to vector<1x8xf32>
    %36 = vector.broadcast %35 : vector<1x8xf32> to vector<8x8xf32>
    %37 = arith.addf %34, %36 : vector<8x8xf32>
    %cst_12 = arith.constant 0.000000e+00 : f32
    %38 = vector.broadcast %cst_12 : f32 to vector<8x8xf32>
    %39 = arith.maximumf %37, %38 : vector<8x8xf32>
    %40 = arith.mulf %16, %17 : vector<8x8xf32>
    %41 = vector.extract_strided_slice %18 {offsets = [3, 0], sizes = [1, 8], strides = [1, 1]} : vector<8x128xf32> to vector<1x8xf32>
    %42 = vector.extract_strided_slice %18 {offsets = [4, 0], sizes = [1, 8], strides = [1, 1]} : vector<8x128xf32> to vector<1x8xf32>
    %43 = vector.extract_strided_slice %18 {offsets = [5, 0], sizes = [1, 1], strides = [1, 1]} : vector<8x128xf32> to vector<1x1xf32>
    %44 = vector.broadcast %41 : vector<1x8xf32> to vector<8x8xf32>
    %45 = arith.mulf %39, %44 : vector<8x8xf32>
    %cst_13 = arith.constant dense<0.000000e+00> : vector<8xf32>
    %46 = vector.multi_reduction <add>, %45, %cst_13 [1] : vector<8x8xf32> to vector<8xf32>
    %47 = vector.shape_cast %46 : vector<8xf32> to vector<8x1xf32>
    %48 = vector.broadcast %42 : vector<1x8xf32> to vector<8x8xf32>
    %49 = arith.mulf %40, %48 : vector<8x8xf32>
    %cst_14 = arith.constant dense<0.000000e+00> : vector<8xf32>
    %50 = vector.multi_reduction <add>, %49, %cst_14 [1] : vector<8x8xf32> to vector<8xf32>
    %51 = vector.shape_cast %50 : vector<8xf32> to vector<8x1xf32>
    %52 = arith.addf %47, %51 : vector<8x1xf32>
    %53 = vector.broadcast %43 : vector<1x1xf32> to vector<8x1xf32>
    %54 = arith.addf %52, %53 : vector<8x1xf32>
    %55 = arith.negf %54 : vector<8x1xf32>
    %56 = math.exp %55 : vector<8x1xf32>
    %cst_15 = arith.constant 1.000000e+00 : f32
    %57 = vector.broadcast %cst_15 : f32 to vector<8x1xf32>
    %58 = arith.addf %57, %56 : vector<8x1xf32>
    %59 = arith.divf %57, %58 : vector<8x1xf32>
    %c0_16 = arith.constant 0 : index
    %c0_17 = arith.constant 0 : index
    %60 = vector.load %arg2[%c0_16, %c0_17] : memref<8x1xf32, #tpu.memory_space<vmem>>, vector<8x1xf32>
    tpu.vector_store %arg2[%c0_16, %c0_17], %59 {strides = array<i32>} : memref<8x1xf32, #tpu.memory_space<vmem>>, vector<8x1xf32>,
    return
  }
}

</mosaic_0001>

<bundles_post_ra>
// kernel: forward.1
= control target key start
LH: loop header
LB: loop body
LE: loop exit
PB: predicated region body
PF: predicated region fallthrough
CT: control target
= control target key end

     0   :  { %7 = vsyncpa [#allocation3], 0  ;;  %s572_s9 = smov [#allocation2]   ;;  %s647_s0 = inlined_call_operand.vmem [shape: s32[8,2], index: 0, kind: input, shape index: {}]   ;;  %s648_s1 = inlined_call_operand.hbm [shape: f32[168,128], index: 1, kind: input, shape index: {}]   ;;  %s649_s2 = inlined_call_operand.vmem [shape: f32[8,1], index: 2, kind: output, shape index: {}]  }
   0x1   :  { %s15_s10 = sshll.u32 %s572_s9, 4  ;;  %s548_s13 = scalar_lea.hbm %s648_s1, 2688  ;;  %s16_s10 = int_to_ptr.vmem [resolvable:$true] %s15_s10 }
   0x2   :  { %p549_p0 = scmp.ne.s32.totalorder %s648_s1, %s548_s13  ;;  %p552_p1 = scmp.lt.u32.totalorder %s548_s13, %s648_s1 }
   0x4   :  { %p554_p2 = pnand %p552_p1, %p549_p0 }
   0x6   :  { %557 = shalt.err (!%p554_p2)
}
   0x7   :  { %s558_s18 = scalar_lea.vmem %s16_s10, 2688  ;;  %p563_p4 = scmp.lt.s32.totalorder %s16_s10, %s16_s10 }
   0x8   :  { %p559_p3 = scmp.ne.s32.totalorder %s16_s10, %s558_s18  ;;  %p564_p5 = scmp.lt.s32.totalorder %s558_s18, %s558_s18 }
   0xa   :  { %p565_p6 = por %p564_p5, %p563_p4 }
   0xc   :  { %p566_p7 = pnand %p565_p6, %p559_p3 }
   0xe   :  { %569 = shalt.err (!%p566_p7)
}
   0xf   :  { %s573_s19 = smov 128   ;;  %s574_s20 = smov 8  }
  0x10   :  { %21 = dma.hbm_to_vmem [thread:$0]  %s648_s1, 2688, %s16_s10, [#allocation3], %s573_s19, %s573_s19, %s574_s20  }
  0x11   :  { %570 = dma.done.wait [#allocation3], 2688  }
  0x12   :  { %571 = vsyncadd [#allocation3], 4294964608  ;;  %v575_v0 = vmov 0   ;;  %v576_v1 = vmov 0.0|0.0   ;;  %v25_v2 = vld [vmem:[%s647_s0] sm:$0xff]  ;;  %v40_v3 = vld [vmem:[#allocation2] sm:$0xff]  ;;  %v26_v27 = vlaneseq }
  0x13   :  { %542 = vset.pattern.permute.xlu0 %v575_v0  ;;  %501 = vmatprep.subr.bf16.mxu0 %v576_v1  ;;  %v41_v4 = vld [vmem:[#allocation2 + $0x8] sm:$0xff]  ;;  %v42_v6 = vld [vmem:[#allocation2 + $0x10] sm:$0xff]  ;;  %v43_v7 = vld [vmem:[#allocation2 + $0x18] sm:$0xff]  ;;  %v32_v8 = vadd.s32 32, %v25_v2  ;;  %v577_v12 = vmov 1   ;;  %vm578_vm0 = vmmov 0  }
  0x14   :  { %519 = vmatprep.subr.bf16.mxu1 %v576_v1  ;;  %29 = vperm.xlu0 %542, %v25_v2   ;;  %v502_v5 = vpack.c.bf16 %v41_v4, %v40_v3  ;;  %v505_v9 = vpack.c.bf16 %v43_v7, %v42_v6  ;;  %v44_v10 = vld [vmem:[#allocation2 + $0x20] sm:$0xff]  ;;  %v45_v11 = vld [vmem:[#allocation2 + $0x28] sm:$0xff]  ;;  %v46_v14 = vld [vmem:[#allocation2 + $0x30] sm:$0xff]  ;;  %v579_v16 = vmov 0.0   ;;  %v27_v29 = vand.u32 127, %v26_v27  ;;  %s580_s0 = smov 120  }
  0x15   :  { %v508_v13 = vpack.c.bf16 %v45_v11, %v44_v10  ;;  %v47_v15 = vld [vmem:[#allocation2 + $0x38] sm:$0xff]  ;;  %473 = vmatprep.mubr.msk.f32.mxu0 %vm578_vm0, %v579_v16  ;;  %v127_v17 = vld [vmem:[#allocation2 + $0x60] sm:$0xff]  ;;  %v128_v18 = vld [vmem:[#allocation2 + $0x68] sm:$0xff]  ;;  %480 = vmatprep.mubr.msk.f32.mxu1 %vm578_vm0, %v579_v16  ;;  %vm52_vm3 = vcmask 785408   ;;  %v626_v32 = vshrl.u32 %v26_v27, 7  ;;  %vm133_vm5 = vcmask 130048  }
  0x16   :  { %503 = vmatpush3.bf16.msra.mxu0 %v502_v5  ;;  %v520_v19 = vpack.c.bf16 %v128_v18, %v127_v17  ;;  %v511_v20 = vpack.c.bf16 %v47_v15, %v46_v14  ;;  %v48_v21 = vld [vmem:[#allocation2 + $0x40] sm:$0xff]  ;;  %v49_v22 = vld [vmem:[#allocation2 + $0x48] sm:$0xff]  ;;  %v50_v24 = vld [vmem:[#allocation2 + $0x50] sm:$0xff]  ;;  %s581_s1 = smov 16   ;;  %s582_s25 = smov 112   ;;  %vm216_vm6 = vcmask 261120  }
  0x17   :  { %504 = vmatprep.subr.bf16.mxu0 %v576_v1  ;;  %v514_v23 = vpack.c.bf16 %v49_v22, %v48_v21  ;;  %v51_v25 = vld [vmem:[#allocation2 + $0x58] sm:$0xff]  ;;  %v208_v33 = vld [vmem:[#allocation2 + $0x70] sm:$0xff]  ;;  %v386_v35 = vsub.s32 4, %v626_v32  ;;  %v126_v36 = vld [vmem:[#allocation2 + $0xa0] sm:$0xff]  ;;  %v131_v48 = vsub.s32 0, %v626_v32  ;;  %vm380_vm7 = vcmask 64512  }
  0x18   :  { %543 = vset.pattern.permute.xlu0 %v577_v12  ;;  %521 = vmatpush3.bf16.msra.mxu1 %v520_v19  ;;  %v517_v26 = vpack.c.bf16 %v51_v25, %v50_v24  ;;  %v209_v34 = vld [vmem:[#allocation2 + $0x78] sm:$0xff]  ;;  %v210_v41 = vld [vmem:[#allocation2 + $0x80] sm:$0xff]  ;;  %v211_v42 = vld [vmem:[#allocation2 + $0x88] sm:$0xff]  ;;  %v214_v59 = vsub.s32 1, %v626_v32  ;;  %v377_v3 = vsub.s32 3, %v626_v32  ;;  %v403_v11 = vsub.s32 5, %v626_v32 }
  0x19   :  { %34 = vperm.xlu0 %543, %v32_v8   ;;  %522 = vmatprep.subr.bf16.mxu1 %v576_v1  ;;  %v523_v37 = vpack.c.bf16 %v209_v34, %v208_v33  ;;  %v387_v40 = vrot.slane %v126_v36, %v386_v35  ;;  %v526_v43 = vpack.c.bf16 %v211_v42, %v210_v41  ;;  %v291_v56 = vld [vmem:[#allocation2 + $0x90] sm:$0xff]  ;;  %v292_v57 = vld [vmem:[#allocation2 + $0x98] sm:$0xff]  ;;  %vm412_vm8 = vcmask 7168  }
  0x1a   :  { %506 = vmatpush3.bf16.msra.mxu0 %v505_v9  ;;  %v132_v49 = vrot.slane %v126_v36, %v131_v48  ;;  %v529_v58 = vpack.c.bf16 %v292_v57, %v291_v56  ;;  %v215_v60 = vrot.slane %v126_v36, %v214_v59  ;;  %v378_v7 = vrot.slane %v126_v36, %v377_v3 }
  0x1b   :  { %507 = vmatprep.subr.bf16.mxu0 %v576_v1  ;;  %v404_v12 = vrot.slane %v126_v36, %v403_v11 }
  0x1e   :  { %509 = vmatpush3.bf16.msra.mxu0 %v508_v13 }
  0x1f   :  { %510 = vmatprep.subr.bf16.mxu0 %v576_v1 }
  0x22   :  { %512 = vmatpush3.bf16.msra.mxu0 %v511_v20 }
  0x23   :  { %513 = vmatprep.subr.bf16.mxu0 %v576_v1 }
  0x26   :  { %515 = vmatpush3.bf16.msra.mxu0 %v514_v23 }
  0x27   :  { %516 = vmatprep.subr.bf16.mxu0 %v576_v1 }
  0x2a   :  { %518 = vmatpush3.bf16.msra.mxu0 %v517_v26 }
  0x93   :  { %v30_v28 = vpop.permute.xlu0 %29 }
  0x94   :  { %vm31_vm1 = vcmp.eq.s32.totalorder %v27_v29, %v30_v28 }
  0x98   :  { %v35_v30 = vpop.permute.xlu0 %34 }
  0x99   :  { %vm36_vm2 = vcmp.eq.s32.totalorder %v27_v29, %v35_v30 }
  0x9a   :  { %vm37_vm4 = vmor %vm31_vm1, %vm36_vm2 }
  0x9b   :  { %v419_v31 = vsel %vm37_vm4, 1.0, %v579_v16 }
  0x9c   :  { %474 = vmatmul.mubr.msk.f32.vlgmr.msra.gmra.mrb[0].mxu0 %vm52_vm3, %v419_v31 }
 0x16f   :  { %v122_v38 = vpop.f32.mrb[0].mxu0 }
 0x170   :  { %371 = vrot.lane.b32.xlu1 %v122_v38, %s580_s0  ;;  %v475_v39 = vpop.f32.mrb[1].mxu0  ;;  %481 = vmatmul.mubr.msk.f32.vlgmr.msra.gmra.mrb[0].mxu1 %vm133_vm5, %v122_v38 }
 0x171   :  { %524 = vmatpush3.bf16.msra.mxu1 %v523_v37  ;;  %491 = vmatprep.mubr.msk.f32.mxu1 %vm578_vm0, %v579_v16 }
 0x172   :  { %525 = vmatprep.subr.bf16.mxu1 %v576_v1 }
 0x174   :  { %389 = vrot.lane.b32.xlu1 %v387_v40, %s581_s1 }
 0x175   :  { %527 = vmatpush3.bf16.msra.mxu1 %v526_v43 }
 0x176   :  { %528 = vmatprep.subr.bf16.mxu1 %v576_v1  ;;  %v295_v1 = vsub.s32 2, %v626_v32 }
 0x178   :  { %v296_v2 = vrot.slane %v126_v36, %v295_v1 }
 0x1e2   :  { %v372_v44 = vpop.permute.xlu1 %371 }
 0x1e3   :  { %v374_v45 = vmul.f32 %v372_v44, %v122_v38 }
 0x1e6   :  { %v390_v46 = vpop.permute.xlu1 %389 }
 0x1e7   :  { %v392_v47 = vmul.f32 %v390_v46, %v374_v45 }
 0x1e9   :  { %394 = vrot.lane.b32.xlu1 %v392_v47, %s582_s25 }
 0x243   :  { %v203_v50 = vpop.f32.mrb[0].mxu1 }
 0x244   :  { %v204_v51 = vadd.f32 %v203_v50, %v132_v49  ;;  %v482_v52 = vpop.f32.mrb[1].mxu1 }
 0x246   :  { %v207_v53 = vmax.f32 %v204_v51, 0.0 }
 0x248   :  { %492 = vmatmul.mubr.msk.f32.vlgmr.msra.gmra.mrb[2].mxu1 %vm216_vm6, %v207_v53 }
 0x249   :  { %498 = vmatprep.mubr.msk.f32.mxu1 %vm578_vm0, %v579_v16  ;;  %530 = vmatpush3.bf16.msra.mxu1 %v529_v58 }
 0x25b   :  { %v395_v54 = vpop.permute.xlu1 %394 }
 0x25c   :  { %v397_v55 = vsel %vm380_vm7, %v395_v54, 0.0 }
 0x25d   :  { %398 = vadd.xlane.f32.xlu1 %v397_v55 }
 0x2ea   :  { %v399_v13 = vpop.xlane.xlu1 %398 }
 0x31b   :  { %v286_v61 = vpop.f32.mrb[2].mxu1 }
 0x31c   :  { %v287_v62 = vadd.f32 %v286_v61, %v215_v60  ;;  %v493_v63 = vpop.f32.mrb[3].mxu1 }
 0x31e   :  { %v290_v0 = vmax.f32 %v287_v62, 0.0 }
 0x320   :  { %499 = vmatmul.mubr.msk.f32.vlgmr.msra.gmra.mrb[4].mxu1 %vm133_vm5, %v290_v0 }
 0x3f3   :  { %v366_v4 = vpop.f32.mrb[4].mxu1 }
 0x3f4   :  { %v367_v5 = vadd.f32 %v366_v4, %v296_v2  ;;  %v500_v6 = vpop.f32.mrb[5].mxu1 }
 0x3f6   :  { %v370_v8 = vmax.f32 %v367_v5, 0.0 }
 0x3f8   :  { %v379_v9 = vmul.f32 %v378_v7, %v370_v8 }
 0x3fa   :  { %v381_v10 = vsel %vm380_vm7, %v379_v9, 0.0 }
 0x3fb   :  { %382 = vadd.xlane.f32.xlu0 %v381_v10 }
 0x488   :  { %v383_v14 = vpop.xlane.xlu0 %382 }
 0x489   :  { %v400_v15 = vadd.f32 %v399_v13, %v383_v14 }
 0x48b   :  { %v405_v16 = vadd.f32 %v404_v12, %v400_v15 }
 0x48d   :  { %v424_v17 = vmul.f32 -1.442695, %v405_v16 }
 0x48f   :  { %544 = vpow2.f32 %v424_v17 }
 0x499   :  { %v545_v18 = vpop.eup %544 }
 0x49a   :  { %v409_v19 = vadd.f32 1.0, %v545_v18 }
 0x49c   :  { %546 = vrcp.f32 %v409_v19 }
 0x4a6   :  { %v547_v20 = vpop.eup %546 }
 0x4a7   :  { %413 = vst.msk [vmem:[%s649_s2] sm:$0xff] %vm412_vm8, %v547_v20 }
 0x4a8   :  { %418 = vsyncpa [#allocation3], 1 }

</bundles_post_ra>
